<compile_context>
chip_gen: v5e
topology: v5e:2x2
jax: 0.10.0
libtpu: 0.0.40
codegen_flags: <defaults>
</compile_context>

<pallas_src>
import jax
import jax.numpy as jnp
from jax.experimental import pallas as pl
from jax.experimental.pallas import tpu as pltpu


def _round_up(n, m):
    return (n + m - 1) // m * m


def _cdiv(a, b):
    return -(-a // b)


def fused_linear_kernel(x_ref, w_ref, b_ref, o_ref):
    # Cast the streamed x tile to the (possibly bf16) weight dtype on the VPU,
    # ONE MXU matmul with f32 accumulation, f32 bias add, lane-dense store.
    x = x_ref[...].astype(w_ref.dtype)
    y = jnp.dot(x, w_ref[...], preferred_element_type=jnp.float32)
    y = y + b_ref[...]
    o_ref[...] = y.astype(o_ref.dtype)


def prepare_params(w1, b1, w2, b2, *, compute_dtype=jnp.bfloat16, block_n=1024):
    """One-time (frozen model) fusion / padding / casting of the weights.

    w1: [in, 10], b1: [10], w2: [10, out], b2: [out]  (pre-transposed layout).
    Returns a dict consumed by mlp_forward; nothing here runs per forward call.
    """
    w1f = w1.astype(jnp.float32)
    w2f = w2.astype(jnp.float32)
    # Pure linear composition (no nonlinearity between the two Linears).
    w = w1f @ w2f                                                # [in, out]
    b = b1.astype(jnp.float32) @ w2f + b2.astype(jnp.float32)    # [out]

    n_out = w.shape[1]
    # Lane-dense padding + N-tile size, chosen once here.
    n128 = _round_up(n_out, 128)
    block_n = max(128, (block_n // 128) * 128)
    n_steps = _cdiv(n128, block_n)
    tn = _round_up(_cdiv(n128, n_steps), 128)
    n_pad = _round_up(n128, tn)
    if n_pad != n_out:
        w = jnp.pad(w, ((0, 0), (0, n_pad - n_out)))
        b = jnp.pad(b, ((0, n_pad - n_out),))
    if compute_dtype is not None:
        w = w.astype(compute_dtype)                 # resident MXU operand
    b_row = b.reshape(1, n_pad)                     # bias add stays f32
    return {"w": w, "b": b_row, "n_out": n_out, "tn": tn}


def mlp_forward(x, params, *, block_m=1024, out_dtype=None, unpad=True):
    """x: [B, in]; params: output of prepare_params."""
    w, b_row = params["w"], params["b"]
    n_out, tn = params["n_out"], params["tn"]
    B, K = x.shape
    n_pad = w.shape[1]
    out_dtype = x.dtype if out_dtype is None else out_dtype

    # Adaptive batch tile: multiple of 8, big enough to amortize per-step
    # overhead, no padding of B up to a full block, and >= 2 parallel grid
    # steps whenever possible so v7x's two TensorCores both get work.
    block_m = max(8, (block_m // 8) * 8)
    b8 = _round_up(B, 8)
    min_steps = 2 if b8 >= 16 else 1
    m_steps = max(min_steps, _cdiv(b8, block_m))
    tm = _round_up(_cdiv(b8, m_steps), 8)
    b_pad = _round_up(B, tm)

    x_in = x
    if b_pad != B:
        x_in = jnp.pad(x_in, ((0, b_pad - B), (0, 0)))

    grid = (b_pad // tm, n_pad // tn)

    out = pl.pallas_call(
        fused_linear_kernel,
        out_shape=jax.ShapeDtypeStruct((b_pad, n_pad), out_dtype),
        grid_spec=pltpu.PrefetchScalarGridSpec(
            num_scalar_prefetch=0,
            grid=grid,
            in_specs=[
                pl.BlockSpec((tm, K), lambda i, j: (i, 0)),   # x tile (streamed)
                pl.BlockSpec((K, tn), lambda i, j: (0, j)),   # fused W tile
                pl.BlockSpec((1, tn), lambda i, j: (0, j)),   # fused bias tile
            ],
            out_specs=pl.BlockSpec((tm, tn), lambda i, j: (i, j)),
        ),
        compiler_params=pltpu.CompilerParams(
            dimension_semantics=("parallel", "parallel"),
        ),
    )(x_in, w, b_row)

    if unpad and (b_pad != B or n_pad != n_out):
        out = out[:B, :n_out]
    return out


def init_params(key, in_features, out_features, hidden=10):
    # Deterministic init mimicking PyTorch's nn.Linear default
    # (uniform(-1/sqrt(fan_in), 1/sqrt(fan_in))), stored transposed [in, out].
    k1, k2, k3, k4 = jax.random.split(key, 4)
    bound1 = 1.0 / jnp.sqrt(in_features)
    bound2 = 1.0 / jnp.sqrt(hidden)
    w1 = jax.random.uniform(k1, (in_features, hidden), jnp.float32, -bound1, bound1)
    b1 = jax.random.uniform(k2, (hidden,), jnp.float32, -bound1, bound1)
    w2 = jax.random.uniform(k3, (hidden, out_features), jnp.float32, -bound2, bound2)
    b2 = jax.random.uniform(k4, (out_features,), jnp.float32, -bound2, bound2)
    return w1, b1, w2, b2


if __name__ == "__main__":
    key = jax.random.PRNGKey(0)
    batch, in_features, out_features = 8, 32, 16

    kx, kp = jax.random.split(key)
    x = jax.random.normal(kx, (batch, in_features), jnp.float32)
    w1, b1, w2, b2 = init_params(kp, in_features, out_features)

    # Reference: same math as the PyTorch forward (two sequential Linears).
    ref = (x @ w1 + b1) @ w2 + b2

    # Default path: one-time prep, bf16 MXU inputs, f32 accumulation/bias.
    params_bf16 = prepare_params(w1, b1, w2, b2)          # compute_dtype=bf16
    fwd_bf16 = jax.jit(lambda xx: mlp_forward(xx, params_bf16))
    out_bf16 = jax.block_until_ready(fwd_bf16(x))
    assert out_bf16.shape == (batch, out_features)
    assert jnp.allclose(out_bf16, ref, atol=5e-2, rtol=5e-2)

    # Full-precision path (compute_dtype=None) for a tight numerical check.
    params_f32 = prepare_params(w1, b1, w2, b2, compute_dtype=None)
    fwd_f32 = jax.jit(lambda xx: mlp_forward(xx, params_f32))
    out_f32 = jax.block_until_ready(fwd_f32(x))
    assert out_f32.shape == (batch, out_features)
    assert jnp.allclose(out_f32, ref, atol=1e-4, rtol=1e-4)

    print("KERNEL_OK")
</pallas_src>

<mosaic_0001>
module attributes {stable_mosaic.version = 11 : i64} {
  func.func @fused_linear_kernel(%arg0: i32, %arg1: i32, %arg2: memref<8x32xf32, #tpu.memory_space<vmem>>, %arg3: memref<32x128xbf16, #tpu.memory_space<vmem>>, %arg4: memref<1x128xf32, #tpu.memory_space<vmem>>, %arg5: memref<8x128xf32, #tpu.memory_space<vmem>>) attributes {dimension_semantics = [#tpu.dimension_semantics<parallel>, #tpu.dimension_semantics<parallel>], iteration_bounds = array<i64: 1, 1>, scalar_prefetch = 0 : i64, scratch_operands = 0 : i64, tpu.core_type = #tpu.core_type<tc>, window_params = [{transform_indices = @transform_0, window_bounds = array<i64: 8, 32>}, {transform_indices = @transform_1, window_bounds = array<i64: 32, 128>}, {transform_indices = @transform_2, window_bounds = array<i64: 1, 128>}, {transform_indices = @transform_3, window_bounds = array<i64: 8, 128>}]} {
    %c0 = arith.constant 0 : index
    %c0_0 = arith.constant 0 : index
    %0 = vector.load %arg2[%c0, %c0_0] : memref<8x32xf32, #tpu.memory_space<vmem>>, vector<8x32xf32>
    %1 = arith.truncf %0 : vector<8x32xf32> to vector<8x32xbf16>
    %c0_1 = arith.constant 0 : index
    %c0_2 = arith.constant 0 : index
    %2 = vector.load %arg3[%c0_1, %c0_2] : memref<32x128xbf16, #tpu.memory_space<vmem>>, vector<32x128xbf16>
    %cst = arith.constant dense<0.000000e+00> : vector<8x128xf32>
    %3 = tpu.matmul %1, %2, %cst {dimension_numbers = #tpu.dot_dimension_numbers<[1], [0], [0], [1], [0, 0, 1, 1], [], []>} : vector<8x32xbf16>, vector<32x128xbf16>, vector<8x128xf32> -> vector<8x128xf32>
    %c0_3 = arith.constant 0 : index
    %c0_4 = arith.constant 0 : index
    %4 = vector.load %arg4[%c0_3, %c0_4] : memref<1x128xf32, #tpu.memory_space<vmem>>, vector<1x128xf32>
    %5 = vector.broadcast %4 : vector<1x128xf32> to vector<8x128xf32>
    %6 = arith.addf %3, %5 : vector<8x128xf32>
    %c0_5 = arith.constant 0 : index
    %c0_6 = arith.constant 0 : index
    %7 = vector.load %arg5[%c0_5, %c0_6] : memref<8x128xf32, #tpu.memory_space<vmem>>, vector<8x128xf32>
    tpu.vector_store %arg5[%c0_5, %c0_6], %6 {strides = array<i32>} : memref<8x128xf32, #tpu.memory_space<vmem>>, vector<8x128xf32>,
    return
  }
  func.func @transform_0(%arg0: i32, %arg1: i32) -> (i32, i32) {
    %c0_i32 = arith.constant 0 : i32
    %c0_i32_0 = arith.constant 0 : i32
    return %arg0, %c0_i32 : i32, i32
  }
  func.func @transform_1(%arg0: i32, %arg1: i32) -> (i32, i32) {
    %c0_i32 = arith.constant 0 : i32
    %c0_i32_0 = arith.constant 0 : i32
    return %c0_i32, %arg1 : i32, i32
  }
  func.func @transform_2(%arg0: i32, %arg1: i32) -> (i32, i32) {
    %c0_i32 = arith.constant 0 : i32
    %c0_i32_0 = arith.constant 0 : i32
    return %c0_i32, %arg1 : i32, i32
  }
  func.func @transform_3(%arg0: i32, %arg1: i32) -> (i32, i32) {
    %c0_i32 = arith.constant 0 : i32
    return %arg0, %arg1 : i32, i32
  }
}

</mosaic_0001>

<bundles_post_ra>
// kernel: _lambda_.1
= control target key start
LH: loop header
LB: loop body
LE: loop exit
PB: predicated region body
PF: predicated region fallthrough
CT: control target
= control target key end

     0   :  { %8 = vsyncpa [#allocation3], 0  ;;  %s236_s0 = inlined_call_operand.hbm [shape: f32[8,32], index: 0, kind: input, shape index: {}]   ;;  %s237_s1 = inlined_call_operand.hbm [shape: bf16[32,128], index: 1, kind: input, shape index: {}]   ;;  %s238_s2 = inlined_call_operand.vmem [shape: f32[1,128], index: 2, kind: input, shape index: {}]   ;;  %s239_s3 = inlined_call_operand.hbm [shape: f32[8,128], index: 3, kind: output, shape index: {}]  }
   0x1   :  { %9 = vsyncpa [#allocation6], 0 }
   0x2   :  { %10 = vsyncpa [#allocation4], 0  ;;  %s16_s14 = sshll.u32 %s236_s0, 4  ;;  %s199_s15 = smov [#allocation2]   ;;  %s17_s14 = int_to_ptr.hbm [resolvable:$true] %s16_s14 }
   0x3   :  { %s18_s16 = sshll.u32 %s199_s15, 4  ;;  %s26_s19 = sshll.u32 %s237_s1, 4  ;;  %s19_s16 = int_to_ptr.vmem [resolvable:$true] %s18_s16  ;;  %s27_s19 = int_to_ptr.hbm [resolvable:$true] %s26_s19 }
   0x4   :  { %21 = dma.hbm_to_vmem [thread:$0]  %s17_s14, 128, %s19_s16, [#allocation3]  }
   0x5   :  { %s200_s20 = smov [#allocation5]   ;;  %s201_s22 = smov 64  }
   0x6   :  { %s28_s21 = sshll.u32 %s200_s20, 4  ;;  %s202_s23 = smov 4   ;;  %s29_s21 = int_to_ptr.vmem [resolvable:$true] %s28_s21 }
   0x7   :  { %34 = dma.hbm_to_vmem [thread:$0]  %s27_s19, 256, %s29_s21, [#allocation6], %s201_s22, %s201_s22, %s202_s23  }
   0x8   :  { %193 = dma.done.wait [#allocation3], 128  }
   0x9   :  { %194 = vsyncadd [#allocation3], 4294967168 }
   0xa   :  { %195 = dma.done.wait [#allocation6], 256  }
   0xb   :  { %196 = vsyncadd [#allocation6], 4294967040  ;;  %v114_v0 = vld [vmem:[#allocation5 + $0x8] sm:$0xff]  ;;  %v113_v1 = vld [vmem:[#allocation5] sm:$0xff]  ;;  %vm68_vm0 = vcmask 261120   ;;  %s203_s24 = smov [#allocation7]  }
   0xc   :  { %78 = vmatpush.bf16.msra.mxu0 %v114_v0  ;;  %v46_v2 = vld [vmem:[#allocation2] sm:$0xff]  ;;  %s91_s25 = sshll.u32 %s203_s24, 4  ;;  %s93_s28 = sshll.u32 %s239_s3, 4  ;;  %s92_s25 = int_to_ptr.vmem [resolvable:$true] %s91_s25  ;;  %s94_s28 = int_to_ptr.hbm [resolvable:$true] %s93_s28 }
   0xd   :  { %v47_v3 = vpack.c.bf16 %v46_v2, %v46_v2  ;;  %v120_v4 = vld [vmem:[%s238_s2] ss:$0 sm:$0xff] }
  0x10   :  { %79 = vmatpush.bf16.msra.mxu0 %v113_v1 }
  0x13   :  { %112 = vmatmul.msk.bf16.vlgmr.msra.gmra.mxu0 %vm68_vm0, %v47_v3 }
  0x90   :  { %v81_v5 = vpop.f32.mrf.mxu0 }
  0x91   :  { %v82_v6 = vadd.f32 %v120_v4, %v81_v5 }
  0x93   :  { %85 = vst [vmem:[#allocation7] sm:$0xff] %v82_v6 }
  0x94   :  { %96 = dma.vmem_to_hbm [thread:$0]  %s92_s25, 128, %s94_s28, [#allocation4]  }
  0x98   :  { %v83_v7 = vpop.f32.mrf.mxu0 }
  0x99   :  { %197 = dma.done.wait [#allocation4], 128  }
  0x9a   :  { %198 = vsyncadd [#allocation4], 4294967168 }
  0x9b   :  { %101 = vsyncpa [#allocation3], 1 }
  0x9c   :  { %102 = vsyncpa [#allocation6], 1 }
  0x9d   :  { %103 = vsyncpa [#allocation4], 1 }

</bundles_post_ra>
